<compile_context>
chip_gen: v7x
topology: tpu7x:2x2x1
jax: 0.10.0
libtpu: 0.0.40
codegen_flags: <defaults>
</compile_context>

<pallas_src>
import functools

import jax
import jax.numpy as jnp
import numpy as np
from jax import lax
from jax.experimental import pallas as pl
from jax.experimental.pallas import tpu as pltpu

EPS = 1e-8


def _round_up(x: int, m: int) -> int:
    return ((x + m - 1) // m) * m


def _cdiv(a: int, b: int) -> int:
    return -(-a // b)


def _vmem_capacity_bytes() -> int:
    """Generation-aware VMEM capacity (v5e/v6e: 128 MiB, v7x: 64 MiB)."""
    try:
        cap = int(pltpu.get_tpu_info().vmem_capacity_bytes)
        if cap > 0:
            return cap
    except Exception:
        pass
    return 64 * 2**20          # conservative fallback (v7x-sized)


def _vmem_limit_bytes() -> int:
    cap = _vmem_capacity_bytes()
    return max(32 * 2**20, min(int(cap * 0.70), cap - 12 * 2**20))


# ------------------------------------------------------------------
# Kernel 1: ISTFT frame synthesis matmul (spec frames -> windowed time frames)
# ------------------------------------------------------------------
def _istft_mm_kernel(spec_ref, basis_ref, frames_ref):
    frames_ref[...] = jnp.dot(
        spec_ref[...], basis_ref[...], preferred_element_type=jnp.float32
    ).astype(frames_ref.dtype)


def _make_istft_basis(n_fft: int) -> tuple[np.ndarray, np.ndarray]:
    """Windowed inverse real-DFT basis with the zero sin rows dropped: (n_fft, n_fft)."""
    F = n_fft // 2 + 1
    n = np.arange(n_fft)[None, :].astype(np.float64)          # (1, n_fft)

    k_cos = np.arange(F)[:, None].astype(np.float64)           # (F, 1)
    w = np.full((F, 1), 2.0)
    w[0, 0] = 1.0
    if n_fft % 2 == 0:
        w[-1, 0] = 1.0
    cos_b = (w * np.cos(2.0 * np.pi * k_cos * n / n_fft)) / n_fft

    # imag rows: DC (and Nyquist for even n_fft) have identically-zero sin basis -> dropped.
    n_sin = F - 2 if n_fft % 2 == 0 else F - 1
    k_sin = np.arange(1, 1 + n_sin)[:, None].astype(np.float64)
    sin_b = (-2.0 * np.sin(2.0 * np.pi * k_sin * n / n_fft)) / n_fft

    # Periodic Hann synthesis window folded into the basis.
    window = 0.5 - 0.5 * np.cos(2.0 * np.pi * np.arange(n_fft) / n_fft)
    basis = np.concatenate([cos_b, sin_b], axis=0) * window[None, :]   # (n_fft, n_fft)
    assert basis.shape[0] == n_fft
    return basis.astype(np.float32), window.astype(np.float32)


def _istft_core(spec: jnp.ndarray, n_fft: int, hop_length: int):
    """spec (B,2,F,T) -> (un-normalized waveform (B,L) f32, OLA norm numpy (L,) f32)."""
    B, two, F, T = spec.shape
    assert two == 2 and F == n_fft // 2 + 1
    L = n_fft + hop_length * (T - 1)

    basis_np, window_np = _make_istft_basis(n_fft)      # (n_fft, n_fft), (n_fft,)
    K, N, M = n_fft, n_fft, B * T
    K_pad = _round_up(K, 128)
    N_pad = _round_up(N, 128)

    vmem_limit = _vmem_limit_bytes()
    budget = int(vmem_limit * 0.80)

    # Column (N) tiling bounds the (double-buffered) bf16 basis slab — required for large
    # n_fft on v7x (64 MiB VMEM); a no-op (N_grid == 1) when the whole basis fits.
    tn = N_pad
    while tn > 128 and 2 * (K_pad * tn * 2) > budget // 2:
        tn = _round_up(max(128, tn // 2), 128)
    N_grid = _cdiv(N_pad, tn)
    N_full = N_grid * tn

    # Row tile: biggest power-of-two that fits the budget, then shrunk to a near-divisor
    # of M (16-aligned for bf16 sublane packing) so M_pad padding waste stays bounded.
    tm = 1024
    while tm > 16 and 2 * (K_pad * tn * 2) + tm * (2 * K_pad * 2 + 2 * tn * 2) > budget:
        tm //= 2
    M_grid = _cdiv(M, tm)
    tm = _round_up(_cdiv(M, M_grid), 16)
    M_pad = M_grid * tm

    basis_pad = np.zeros((K_pad, N_full), np.float32)
    basis_pad[:K, :N] = basis_np
    basis = jnp.asarray(basis_pad, dtype=jnp.bfloat16)

    # Pack spec to (B*T, n_fft), keeping only the non-degenerate basis rows
    # [real_0..real_{F-1}, imag_1..imag_{F-2 (even) / F-1 (odd)}].
    # TODO(synk): this (B,2,F,T)->(B*T,n_fft) reorder is still one XLA transpose pass over
    # the spectrogram; folding it into the kernel would save an HBM round trip.
    n_sin = F - 2 if n_fft % 2 == 0 else F - 1
    spec_k = jnp.concatenate([spec[:, 0, :, :], spec[:, 1, 1:1 + n_sin, :]], axis=1)
    spec_flat = jnp.transpose(spec_k, (0, 2, 1)).reshape(M, K).astype(jnp.bfloat16)
    spec_flat = jnp.pad(spec_flat, ((0, M_pad - M), (0, K_pad - K)))

    frames = pl.pallas_call(
        _istft_mm_kernel,
        out_shape=jax.ShapeDtypeStruct((M_pad, N_full), jnp.bfloat16),
        grid=(N_grid, M_grid),                     # N outermost: basis fetched once per col tile
        in_specs=[
            pl.BlockSpec((tm, K_pad), lambda j, i: (i, 0)),
            pl.BlockSpec((K_pad, tn), lambda j, i: (0, j)),
        ],
        out_specs=pl.BlockSpec((tm, tn), lambda j, i: (i, j)),
        compiler_params=pltpu.CompilerParams(
            dimension_semantics=("parallel", "parallel"),
            vmem_limit_bytes=vmem_limit,
        ),
    )(spec_flat, basis)

    frames = frames[:M, :N].reshape(B, T, n_fft)

    # Overlap-add: one fused elementwise sum of n_seg shifted / zero-padded segments
    # (single HBM pass; no read-modify-write chain).
    n_seg = _cdiv(n_fft, hop_length)
    L_acc = (n_seg - 1) * hop_length + T * hop_length
    wav = None
    for s in range(n_seg):
        w = min(hop_length, n_fft - s * hop_length)
        chunk = frames[:, :, s * hop_length:s * hop_length + w].astype(jnp.float32)
        if w < hop_length:
            chunk = jnp.pad(chunk, ((0, 0), (0, 0), (0, hop_length - w)))
        seg = chunk.reshape(B, T * hop_length)
        seg = jnp.pad(seg, ((0, 0),
                            (s * hop_length, L_acc - s * hop_length - T * hop_length)))
        wav = seg if wav is None else wav + seg
    wav = wav[:, :L]

    # Squared-window OLA normalization: input independent -> constant-fold in numpy.
    # (Applied downstream, fused into the SI-SNR kernel.)
    win_sq = window_np.astype(np.float64) ** 2
    wsq_ola = np.zeros(L, dtype=np.float64)
    for t in range(T):
        wsq_ola[t * hop_length: t * hop_length + n_fft] += win_sq
    norm = np.where(wsq_ola > 1e-11, 1.0 / (wsq_ola + EPS), 1.0).astype(np.float32)
    return wav, norm


def istft(spec: jnp.ndarray, n_fft: int, hop_length: int) -> jnp.ndarray:
    """Standalone ISTFT: spec (B,2,F,T) -> waveform (B, L) with OLA normalization."""
    wav, norm = _istft_core(spec, n_fft, hop_length)
    return wav * jnp.asarray(norm)[None, :]


# ------------------------------------------------------------------
# Kernel 2: negative SI-SNR over (B, L) waveforms (closed form, L-tiled, 2-way split)
# ------------------------------------------------------------------
def _si_snr_kernel(s1_ref, s2_ref, norm_ref, oa_ref, ob_ref, oc_ref,
                   acc_a, acc_b, acc_c, *, L, l_tile, Kt):
    c = pl.program_id(0)          # reduction half (parallel -> both TCs on v7x)
    k = pl.program_id(1)          # L-tile within the half (arbitrary)

    @pl.when(k == 0)
    def _():
        acc_a[...] = jnp.zeros_like(acc_a)
        acc_b[...] = jnp.zeros_like(acc_b)
        acc_c[...] = jnp.zeros_like(acc_c)

    # Mask the ragged tail in-kernel (inputs are NOT padded on the host).
    col0 = (c * Kt + k) * l_tile
    lane = lax.broadcasted_iota(jnp.int32, (1, l_tile), 1)
    valid = (lane + col0) < L

    s1 = jnp.where(valid, s1_ref[...], 0.0)
    s2 = jnp.where(valid, s2_ref[...] * norm_ref[...], 0.0)   # OLA norm fused here

    # Full-width elementwise accumulation: no per-step cross-lane (XLU) reduce.
    acc_a[...] += s1 * s2
    acc_b[...] += s2 * s2
    acc_c[...] += s1 * s1

    @pl.when(k == Kt - 1)
    def _():
        oa_ref[...] = jnp.sum(acc_a[...], axis=1, keepdims=True)[None]   # (1, B, 1)
        ob_ref[...] = jnp.sum(acc_b[...], axis=1, keepdims=True)[None]
        oc_ref[...] = jnp.sum(acc_c[...], axis=1, keepdims=True)[None]


def neg_si_snr(s1: jnp.ndarray, s2: jnp.ndarray, norm: np.ndarray | None = None) -> jnp.ndarray:
    """-si_snr(s1, s2 * norm).  norm (optional, numpy, length L) is fused in-kernel."""
    B, L = s1.shape
    Bp = _round_up(B, 8)                       # VMEM sublane-padded batch

    vmem_limit = _vmem_limit_bytes()
    # l_tile: ~a few MiB per (padded) input block, bounded by a fraction of the VMEM limit.
    per_lane = (7 * Bp + 2 * 8) * 4            # s1,s2 (x2 buf) + 3 accumulators + norm (x2 buf)
    l_tile = min(int(vmem_limit * 0.6) // per_lane, (4 * 2**20) // (Bp * 4))
    l_tile = max(128, (l_tile // 128) * 128)
    l_tile = min(l_tile, max(128, _round_up(L, 128)))

    Nt = _cdiv(L, l_tile)                      # real L tiles
    C = 2                                      # split the reduction for 2-TC (v7x) chips
    Kt = _cdiv(Nt, C)
    Lp = Nt * l_tile

    norm_full = np.zeros((1, Lp), np.float32)
    if norm is None:
        norm_full[0, :L] = 1.0
    else:
        norm_full[0, :L] = np.asarray(norm, np.float32)
    norm_j = jnp.asarray(norm_full)

    # Block index clamped to the last real tile; fully-out-of-range steps are zeroed by
    # the in-kernel mask, so no host-side padding of s1/s2 is needed.
    def in_map(c, k):
        return (0, jnp.minimum(c * Kt + k, Nt - 1))

    kern = functools.partial(_si_snr_kernel, L=L, l_tile=l_tile, Kt=Kt)
    oa, ob, oc = pl.pallas_call(
        kern,
        out_shape=(jax.ShapeDtypeStruct((C, B, 1), jnp.float32),) * 3,
        grid=(C, Kt),
        in_specs=[
            pl.BlockSpec((B, l_tile), in_map),
            pl.BlockSpec((B, l_tile), in_map),
            pl.BlockSpec((1, l_tile), in_map),
        ],
        out_specs=(pl.BlockSpec((1, B, 1), lambda c, k: (c, 0, 0)),) * 3,
        scratch_shapes=[pltpu.VMEM((B, l_tile), jnp.float32)] * 3,
        compiler_params=pltpu.CompilerParams(
            dimension_semantics=("parallel", "arbitrary"),
            vmem_limit_bytes=vmem_limit,
        ),
    )(s1.astype(jnp.float32), s2.astype(jnp.float32), norm_j)

    # O(B) epilogue: combine the two partial halves and evaluate the closed form.
    a = jnp.sum(oa[:, :, 0], axis=0)           # sum(s1*s2)  per row
    b = jnp.sum(ob[:, :, 0], axis=0)           # sum(s2*s2)
    c = jnp.sum(oc[:, :, 0], axis=0)           # sum(s1*s1)
    scale = a / (b + EPS)                      # s1·s2 / (||s2||^2 + eps)
    target_norm = scale * scale * b            # ||s_target||^2
    noise_norm = c - 2.0 * scale * a + target_norm   # ||s1 - s_target||^2
    snr = 10.0 * jnp.log10(target_norm / (noise_norm + EPS) + EPS)
    return -jnp.mean(snr)


# ------------------------------------------------------------------
# Module equivalent: SISNRLoss.forward
# ------------------------------------------------------------------
def sisnr_loss_forward(s1: jnp.ndarray, s2_spec: jnp.ndarray,
                       n_fft: int, hop_length: int) -> jnp.ndarray:
    # TODO(synk): the original ISTFT module's exact window/center/normalization is not
    # given; a deterministic Hann-windowed inverse-rDFT overlap-add ISTFT is used.
    wav, norm = _istft_core(s2_spec, n_fft, hop_length)   # (B, L) un-normalized + numpy norm
    return neg_si_snr(s1, wav, norm=norm)                 # -si_snr(s1, istft(s2))


if __name__ == "__main__":
    n_fft, hop = 16, 8
    B, T = 2, 8
    F = n_fft // 2 + 1
    L = n_fft + hop * (T - 1)                # 72

    key = jax.random.PRNGKey(0)
    k1, k2 = jax.random.split(key)
    s1 = jax.random.normal(k1, (B, L), dtype=jnp.float32)
    s2_spec = jax.random.normal(k2, (B, 2, F, T), dtype=jnp.float32)

    loss = jax.block_until_ready(sisnr_loss_forward(s1, s2_spec, n_fft, hop))
    assert loss.shape == () and bool(jnp.isfinite(loss))
    print("KERNEL_OK")
</pallas_src>

<mosaic_0001>
module attributes {stable_mosaic.version = 11 : i64} {
  func.func @_istft_mm_kernel(%arg0: i32, %arg1: i32, %arg2: memref<16x128xbf16, #tpu.memory_space<vmem>>, %arg3: memref<128x128xbf16, #tpu.memory_space<vmem>>, %arg4: memref<16x128xbf16, #tpu.memory_space<vmem>>) attributes {dimension_semantics = [#tpu.dimension_semantics<parallel>, #tpu.dimension_semantics<parallel>], iteration_bounds = array<i64: 1, 1>, scalar_prefetch = 0 : i64, scratch_operands = 0 : i64, tpu.core_type = #tpu.core_type<tc>, window_params = [{transform_indices = @transform_0, window_bounds = array<i64: 16, 128>}, {transform_indices = @transform_1, window_bounds = array<i64: 128, 128>}, {transform_indices = @transform_2, window_bounds = array<i64: 16, 128>}]} {
    %c0 = arith.constant 0 : index
    %c0_0 = arith.constant 0 : index
    %0 = vector.load %arg2[%c0, %c0_0] : memref<16x128xbf16, #tpu.memory_space<vmem>>, vector<16x128xbf16>
    %c0_1 = arith.constant 0 : index
    %c0_2 = arith.constant 0 : index
    %1 = vector.load %arg3[%c0_1, %c0_2] : memref<128x128xbf16, #tpu.memory_space<vmem>>, vector<128x128xbf16>
    %cst = arith.constant dense<0.000000e+00> : vector<16x128xf32>
    %2 = tpu.matmul %0, %1, %cst {dimension_numbers = #tpu.dot_dimension_numbers<[1], [0], [0], [1], [0, 0, 1, 1], [], []>} : vector<16x128xbf16>, vector<128x128xbf16>, vector<16x128xf32> -> vector<16x128xf32>
    %3 = arith.truncf %2 : vector<16x128xf32> to vector<16x128xbf16>
    %c0_3 = arith.constant 0 : index
    %c0_4 = arith.constant 0 : index
    %4 = vector.load %arg4[%c0_3, %c0_4] : memref<16x128xbf16, #tpu.memory_space<vmem>>, vector<16x128xbf16>
    tpu.vector_store %arg4[%c0_3, %c0_4], %3 {strides = array<i32>} : memref<16x128xbf16, #tpu.memory_space<vmem>>, vector<16x128xbf16>,
    return
  }
  func.func @transform_0(%arg0: i32, %arg1: i32) -> (i32, i32) {
    %c0_i32 = arith.constant 0 : i32
    %c0_i32_0 = arith.constant 0 : i32
    return %arg1, %c0_i32 : i32, i32
  }
  func.func @transform_1(%arg0: i32, %arg1: i32) -> (i32, i32) {
    %c0_i32 = arith.constant 0 : i32
    %c0_i32_0 = arith.constant 0 : i32
    return %c0_i32, %arg0 : i32, i32
  }
  func.func @transform_2(%arg0: i32, %arg1: i32) -> (i32, i32) {
    %c0_i32 = arith.constant 0 : i32
    return %arg1, %arg0 : i32, i32
  }
}

</mosaic_0001>

<bundles_post_ra>
// kernel: tpu_custom_call.1
= control target key start
LH: loop header
LB: loop body
LE: loop exit
PB: predicated region body
PF: predicated region fallthrough
CT: control target
= control target key end

     0   :  { %7 = vsyncpa [#allocation3], 0  ;;  %s384_s0 = inlined_call_operand.hbm [shape: bf16[16,128], index: 0, kind: input, shape index: {}]   ;;  %s385_s1 = inlined_call_operand.hbm [shape: bf16[128,128], index: 1, kind: input, shape index: {}]   ;;  %s386_s2 = inlined_call_operand.hbm [shape: bf16[16,128], index: 2, kind: output, shape index: {}]  }
   0x1   :  { %8 = vsyncpa [#allocation6], 0 }
   0x2   :  { %9 = vsyncpa [#allocation4], 0  ;;  %s317_s9 = smov [#allocation2]   ;;  %s245_s13 = scalar_lea.hbm %s384_s0, 128 }
   0x3   :  { %s15_s10 = sshll.u32 %s317_s9, 4  ;;  %p246_p0 = scmp.ne.s32.totalorder %s384_s0, %s245_s13  ;;  %s16_s10 = int_to_ptr.vmem [resolvable:$true] %s15_s10 }
   0x4   :  { %p249_p1 = scmp.lt.u32.totalorder %s245_s13, %s384_s0 }
   0x6   :  { %p251_p2 = pnand %p249_p1, %p246_p0 }
   0x8   :  { %254 = shalt.err (!%p251_p2)
}
   0x9   :  { %s255_s18 = scalar_lea.vmem %s16_s10, 128  ;;  %p260_p4 = scmp.lt.s32.totalorder %s16_s10, %s16_s10 }
   0xa   :  { %p256_p3 = scmp.ne.s32.totalorder %s16_s10, %s255_s18  ;;  %p261_p5 = scmp.lt.s32.totalorder %s255_s18, %s255_s18 }
   0xc   :  { %p262_p6 = por %p261_p5, %p260_p4 }
   0xe   :  { %p263_p7 = pnand %p262_p6, %p256_p3 }
  0x10   :  { %266 = shalt.err (!%p263_p7)
}
  0x11   :  { %s318_s19 = smov 64   ;;  %s319_s20 = smov 4  }
  0x12   :  { %21 = dma.hbm_to_vmem [thread:$0]  %s384_s0, 128, %s16_s10, [#allocation3], %s318_s19, %s318_s19, %s319_s20  }
  0x13   :  { %s320_s23 = smov [#allocation5]   ;;  %s267_s27 = scalar_lea.hbm %s385_s1, 1024 }
  0x14   :  { %s27_s24 = sshll.u32 %s320_s23, 4  ;;  %p268_p8 = scmp.ne.s32.totalorder %s385_s1, %s267_s27  ;;  %s28_s24 = int_to_ptr.vmem [resolvable:$true] %s27_s24 }
  0x15   :  { %p271_p9 = scmp.lt.u32.totalorder %s267_s27, %s385_s1 }
  0x17   :  { %p273_p10 = pnand %p271_p9, %p268_p8 }
  0x19   :  { %276 = shalt.err (!%p273_p10)
}
  0x1a   :  { %s277_s4 = scalar_lea.vmem %s28_s24, 1024  ;;  %p282_p12 = scmp.lt.s32.totalorder %s28_s24, %s28_s24 }
  0x1b   :  { %p278_p11 = scmp.ne.s32.totalorder %s28_s24, %s277_s4  ;;  %p283_p13 = scmp.lt.s32.totalorder %s277_s4, %s277_s4 }
  0x1d   :  { %p284_p0 = por %p283_p13, %p282_p12 }
  0x1f   :  { %p285_p1 = pnand %p284_p0, %p278_p11 }
  0x21   :  { %288 = shalt.err (!%p285_p1)
}
  0x22   :  { %33 = dma.hbm_to_vmem [thread:$0]  %s385_s1, 1024, %s28_s24, [#allocation6], %s318_s19, %s318_s19, %s319_s20  }
  0x23   :  { %311 = dma.done.wait [#allocation3], 128  }
  0x24   :  { %312 = vsyncadd [#allocation3], 4294967168 }
  0x25   :  { %313 = dma.done.wait [#allocation6], 1024  }
  0x26   :  { %314 = vsyncadd [#allocation6], 4294966272  ;;  %v321_v0 = vmov 0.0   ;;  %vm322_vm0 = vmmov 0   ;;  %v236_v1 = vld [vmem:[#allocation5] sm:$0xff]   ;;  %v237_v2 = vld [vmem:[#allocation5 + $0x8] sm:$0xff]  }
  0x27   :  { %209 = vmatprep.subr.bf16.mxu0 %v321_v0  ;;  %225 = vmatprep.mubr.msk.bf16.mxu0 %vm322_vm0, %v321_v0  ;;  %v238_v3 = vld [vmem:[#allocation5 + $0x10] sm:$0xff]   ;;  %v239_v4 = vld [vmem:[#allocation5 + $0x18] sm:$0xff]   ;;  %v240_v5 = vld [vmem:[#allocation5 + $0x20] sm:$0xff]   ;;  %s323_s1 = smov [#allocation7]  }
  0x28   :  { %210 = vmatpush3.bf16.msra.mxu0 %v236_v1  ;;  %v241_v6 = vld [vmem:[#allocation5 + $0x28] sm:$0xff]   ;;  %v242_v7 = vld [vmem:[#allocation5 + $0x30] sm:$0xff]   ;;  %v243_v8 = vld [vmem:[#allocation5 + $0x38] sm:$0xff]   ;;  %s169_s6 = sshll.u32 %s323_s1, 4  ;;  %s170_s6 = int_to_ptr.vmem [resolvable:$true] %s169_s6 }
  0x29   :  { %211 = vmatprep.subr.bf16.mxu0 %v321_v0  ;;  %v244_v9 = vld [vmem:[#allocation2] sm:$0xff]   ;;  %s289_s7 = scalar_lea.vmem %s170_s6, 128  ;;  %p294_p3 = scmp.lt.s32.totalorder %s170_s6, %s170_s6 }
  0x2a   :  { %p290_p2 = scmp.ne.s32.totalorder %s170_s6, %s289_s7  ;;  %p295_p4 = scmp.lt.s32.totalorder %s289_s7, %s289_s7 }
  0x2c   :  { %212 = vmatpush3.bf16.msra.mxu0 %v237_v2  ;;  %p296_p5 = por %p295_p4, %p294_p3 }
  0x2d   :  { %213 = vmatprep.subr.bf16.mxu0 %v321_v0 }
  0x2e   :  { %p297_p6 = pnand %p296_p5, %p290_p2 }
  0x30   :  { %214 = vmatpush3.bf16.msra.mxu0 %v238_v3 }
  0x31   :  { %215 = vmatprep.subr.bf16.mxu0 %v321_v0 }
  0x34   :  { %216 = vmatpush3.bf16.msra.mxu0 %v239_v4 }
  0x35   :  { %217 = vmatprep.subr.bf16.mxu0 %v321_v0 }
  0x38   :  { %218 = vmatpush3.bf16.msra.mxu0 %v240_v5 }
  0x39   :  { %219 = vmatprep.subr.bf16.mxu0 %v321_v0 }
  0x3c   :  { %220 = vmatpush3.bf16.msra.mxu0 %v241_v6 }
  0x3d   :  { %221 = vmatprep.subr.bf16.mxu0 %v321_v0 }
  0x40   :  { %222 = vmatpush3.bf16.msra.mxu0 %v242_v7 }
  0x41   :  { %223 = vmatprep.subr.bf16.mxu0 %v321_v0 }
  0x44   :  { %224 = vmatpush3.bf16.msra.mxu0 %v243_v8 }
  0x47   :  { %226 = vmatmul.mubr.bf16.vlgmr.msra.gmra.mrb[0].mxu0 %v244_v9 }
 0x11a   :  { %v147_v10 = vpop.f32.mrb[0].mxu0 }
 0x11b   :  { %v227_v11 = vpop.f32.mrb[1].mxu0 }
 0x11c   :  { %v150_v12 = vpop.f32.mrb[2].mxu0 }
 0x11d   :  { %v198_v13 = vpack.c.bf16 %v150_v12, %v147_v10  ;;  %v228_v14 = vpop.f32.mrb[3].mxu0 }
 0x11f   :  { %199 = vst [vmem:[#allocation7] sm:$0xff] %v198_v13  }
 0x120   :  { %300 = shalt.err (!%p297_p6)
}
 0x121   :  { %s301_s10 = scalar_lea.hbm %s386_s2, 128 }
 0x122   :  { %p302_p7 = scmp.ne.s32.totalorder %s386_s2, %s301_s10  ;;  %p305_p8 = scmp.lt.u32.totalorder %s301_s10, %s386_s2 }
 0x124   :  { %p307_p9 = pnand %p305_p8, %p302_p7 }
 0x126   :  { %310 = shalt.err (!%p307_p9)
}
 0x127   :  { %175 = dma.vmem_to_hbm [thread:$0]  %s170_s6, 128, %s386_s2, [#allocation4], %s318_s19, %s318_s19, %s319_s20  }
 0x128   :  { %315 = dma.done.wait [#allocation4], 128  }
 0x129   :  { %316 = vsyncadd [#allocation4], 4294967168 }
 0x12a   :  { %179 = vsyncpa [#allocation3], 1 }
 0x12b   :  { %180 = vsyncpa [#allocation6], 1 }
 0x12c   :  { %181 = vsyncpa [#allocation4], 1 }

</bundles_post_ra>
